<compile_context>
chip_gen: v5e
topology: v5e:2x2
jax: 0.10.0
libtpu: 0.0.40
codegen_flags: <defaults>
</compile_context>

<pallas_src>
import functools

import jax
import jax.numpy as jnp
from jax import lax
from jax.experimental import pallas as pl
from jax.experimental.pallas import tpu as pltpu


def _nl_flash_kernel(q_ref, k_ref, wc_ref, bout_ref, o_ref, m_sc, l_sc, acc_sc):
    """One (batch, q-tile, kv-tile) grid step of the fused non-local block.

    q_ref/k_ref : (1, tq, Cp) / (1, tk, Cp) tiles of the rearranged input X.
    wc_ref      : (Cp, Cp) fused, pre-transposed weight  Wc = Wg^T @ Ww^T.
    bout_ref    : (1, Cp)  fused bias  bg @ Ww^T + bw  (f32).
    o_ref       : (1, tq, Cp) output tile = softmax(X X^T) @ (X Wc) + bout + X.
    m/l/acc     : online-softmax running max / denom / numerator (f32 VMEM).
    """
    ki = pl.program_id(2)

    @pl.when(ki == 0)
    def _init():
        m_sc[...] = jnp.full_like(m_sc, -jnp.inf)
        l_sc[...] = jnp.zeros_like(l_sc)
        acc_sc[...] = jnp.zeros_like(acc_sc)

    dt = q_ref.dtype
    q = q_ref[0]                                    # (tq, Cp), input dtype
    k = k_ref[0]                                    # (tk, Cp), input dtype

    # scores = Q @ K^T: contract the channel dims directly (no in-kernel .T)
    s = lax.dot_general(q, k, (((1,), (1,)), ((), ())),
                        preferred_element_type=jnp.float32)        # (tq, tk)

    m_prev = m_sc[...]
    m_new = jnp.maximum(m_prev, jnp.max(s, axis=-1, keepdims=True))
    alpha = jnp.exp(m_prev - m_new)                 # (tq, 1) rescale factor
    p = jnp.exp(s - m_new)                          # (tq, tk) unnormalized, f32

    # fused 1x1 convs: Gc tile = K_tile @ Wc (bias folded into bout, added once
    # at finalize).  Recomputed per q-tile: cheap vs. O(N*tk) attention matmuls
    # and keeps the whole block a single HBM pass.
    gc = jnp.dot(k, wc_ref[...], preferred_element_type=jnp.float32).astype(dt)

    l_sc[...] = alpha * l_sc[...] + jnp.sum(p, axis=-1, keepdims=True)
    acc_sc[...] = alpha * acc_sc[...] + jnp.dot(
        p.astype(dt), gc, preferred_element_type=jnp.float32)
    m_sc[...] = m_new

    @pl.when(ki == pl.num_programs(2) - 1)
    def _finalize():
        # deferred softmax normalization: one EUP reciprocal + [tq, Cp] multiply
        inv_l = pl.reciprocal(l_sc[...], approx=True)
        out = acc_sc[...] * inv_l + bout_ref[...] + q.astype(jnp.float32)
        o_ref[0] = out.astype(o_ref.dtype)          # residual fused in


def _pick_tile(n: int, cap: int) -> int:
    """Largest divisor of n that is <= cap and a multiple of 8 (sublane-aligned).
    Falls back to the full extent, which is always a legal block dim."""
    for t in range(min(cap, n), 7, -1):
        if n % t == 0 and t % 8 == 0:
            return t
    return n


@functools.partial(jax.jit,
                   static_argnames=("r", "compute_dtype", "tq_cap", "tk_cap"))
def nonlocal_block_pallas(xs, wg, bg, ww, bw, *, r=2,
                          compute_dtype=jnp.float32,
                          tq_cap=512, tk_cap=1024):
    """xs: [B, 3, T, H, W].  wg/ww: [C, C] (out, in) 1x1-conv weights, bg/bw: [C]."""
    B, c3, T, H, W = xs.shape
    assert c3 == 3 and H % r == 0 and W % r == 0
    h, w = H // r, W // r
    C = 3 * T * r * r
    N = h * w
    Cp = max(128, ((C + 127) // 128) * 128)   # lane-dense channel dim

    # rearrange 'b c t (h rh) (w rw) -> b (h w) (c t rh rw)'
    # TODO(synk): fold this r x r pixel-unshuffle (and its inverse below) into
    # the BlockSpec index_map to save two full-tensor HBM passes.
    x_ = xs.reshape(B, 3, T, h, r, w, r).transpose(0, 1, 2, 4, 6, 3, 5)
    theta = x_.reshape(B, C, h, w).transpose(0, 2, 3, 1).reshape(B, N, C)
    theta_p = jnp.pad(theta, ((0, 0), (0, 0), (0, Cp - C))).astype(compute_dtype)

    # fuse the two 1x1 convs (F is row-stochastic, so the bg term passes through):
    #   y = F @ (X @ Wg^T) @ Ww^T + bg @ Ww^T + bw = F @ (X @ Wc) + bout
    wg32, ww32 = wg.astype(jnp.float32), ww.astype(jnp.float32)
    wc = jnp.dot(wg32.T, ww32.T)                                    # (C, C)
    bout = jnp.dot(bg.astype(jnp.float32), ww32.T) + bw.astype(jnp.float32)
    wc_p = jnp.pad(wc, ((0, Cp - C), (0, Cp - C))).astype(compute_dtype)
    bout_p = jnp.pad(bout, (0, Cp - C)).reshape(1, Cp).astype(jnp.float32)

    tq = _pick_tile(N, tq_cap)
    tk = _pick_tile(N, tk_cap)

    out_nc = pl.pallas_call(
        _nl_flash_kernel,
        out_shape=jax.ShapeDtypeStruct((B, N, Cp), xs.dtype),
        grid_spec=pltpu.PrefetchScalarGridSpec(
            num_scalar_prefetch=0,
            grid=(B, N // tq, N // tk),
            in_specs=[
                pl.BlockSpec((1, tq, Cp), lambda b, qi, ki: (b, qi, 0)),  # Q tile
                pl.BlockSpec((1, tk, Cp), lambda b, qi, ki: (b, ki, 0)),  # K tile
                pl.BlockSpec((Cp, Cp), lambda b, qi, ki: (0, 0)),         # Wc
                pl.BlockSpec((1, Cp), lambda b, qi, ki: (0, 0)),          # bout
            ],
            out_specs=pl.BlockSpec((1, tq, Cp), lambda b, qi, ki: (b, qi, 0)),
            scratch_shapes=[
                pltpu.VMEM((tq, 1), jnp.float32),    # running max
                pltpu.VMEM((tq, 1), jnp.float32),    # running denom
                pltpu.VMEM((tq, Cp), jnp.float32),   # running numerator
            ],
        ),
        compiler_params=pltpu.CompilerParams(
            dimension_semantics=("parallel", "parallel", "arbitrary"),
            # explicit limit with headroom; tiles are sized to fit well inside
            # v7x's 64 MiB physical VMEM (and v5e/v6e's 128 MiB).
            vmem_limit_bytes=48 * 1024 * 1024,
        ),
    )(theta_p, theta_p, wc_p, bout_p)

    # un-pad + inverse rearrange; the residual add is already fused in-kernel.
    y = out_nc[:, :, :C].astype(xs.dtype)
    y = y.reshape(B, h, w, 3, T, r, r).transpose(0, 3, 4, 1, 5, 2, 6)
    return y.reshape(B, 3, T, H, W)


def _reference(xs, wg, bg, ww, bw, r=2):
    # pure-JAX f32 reference of the PyTorch forward
    B, _, T, H, W = xs.shape
    h, w = H // r, W // r
    C = 3 * T * r * r
    N = h * w
    x_ = xs.reshape(B, 3, T, h, r, w, r).transpose(0, 1, 2, 4, 6, 3, 5)
    x_ = x_.reshape(B, C, h, w)
    theta = x_.transpose(0, 2, 3, 1).reshape(B, N, C)
    g = jnp.einsum('bnc,oc->bno', theta, wg) + bg
    f = jax.nn.softmax(jnp.einsum('bnc,bmc->bnm', theta, theta), axis=-1)
    y = jnp.einsum('bnm,bmc->bnc', f, g)
    y = jnp.einsum('bnc,oc->bno', y, ww) + bw
    y = y.reshape(B, h, w, 3, T, r, r).transpose(0, 3, 4, 1, 5, 2, 6)
    return xs + y.reshape(B, 3, T, H, W)


if __name__ == "__main__":
    key = jax.random.PRNGKey(0)
    B, T, r, H, W = 2, 2, 2, 16, 16
    C = 3 * T * r * r
    k1, k2, k3, k4, k5 = jax.random.split(key, 5)
    xs = jax.random.normal(k1, (B, 3, T, H, W), dtype=jnp.float32)
    # conv weights [C_out, C_in, 1, 1] -> [C, C]; deterministic init
    wg = jax.random.normal(k2, (C, C), dtype=jnp.float32) * 0.05
    bg = jax.random.normal(k3, (C,), dtype=jnp.float32) * 0.05
    ww = jax.random.normal(k4, (C, C), dtype=jnp.float32) * 0.05
    bw = jax.random.normal(k5, (C,), dtype=jnp.float32) * 0.05

    ref = _reference(xs, wg, bg, ww, bw, r=r)

    # f32 path (v5e-safe): tight check against the pure-JAX reference.
    out = nonlocal_block_pallas(xs, wg, bg, ww, bw, r=r,
                                compute_dtype=jnp.float32)
    out = jax.block_until_ready(out)
    assert out.shape == xs.shape
    assert jnp.allclose(out, ref, atol=1e-3, rtol=1e-3)

    # bf16 MXU-operand path (v6e/v7x): looser tolerance (bf16 inputs).
    out_bf16 = nonlocal_block_pallas(xs, wg, bg, ww, bw, r=r,
                                     compute_dtype=jnp.bfloat16)
    out_bf16 = jax.block_until_ready(out_bf16)
    assert jnp.allclose(out_bf16, ref, atol=5e-2, rtol=5e-2)

    print("KERNEL_OK")
</pallas_src>

<mosaic_0001>
module attributes {stable_mosaic.version = 11 : i64} {
  func.func @_nl_flash_kernel(%arg0: i32, %arg1: i32, %arg2: i32, %arg3: memref<1x64x128xf32, #tpu.memory_space<vmem>>, %arg4: memref<1x64x128xf32, #tpu.memory_space<vmem>>, %arg5: memref<128x128xf32, #tpu.memory_space<vmem>>, %arg6: memref<1x128xf32, #tpu.memory_space<vmem>>, %arg7: memref<1x64x128xf32, #tpu.memory_space<vmem>>, %arg8: memref<64x1xf32, #tpu.memory_space<vmem>>, %arg9: memref<64x1xf32, #tpu.memory_space<vmem>>, %arg10: memref<64x128xf32, #tpu.memory_space<vmem>>) attributes {dimension_semantics = [#tpu.dimension_semantics<parallel>, #tpu.dimension_semantics<parallel>, #tpu.dimension_semantics<arbitrary>], iteration_bounds = array<i64: 2, 1, 1>, scalar_prefetch = 0 : i64, scratch_operands = 3 : i64, tpu.core_type = #tpu.core_type<tc>, window_params = [{transform_indices = @transform_0, window_bounds = array<i64: 1, 64, 128>}, {transform_indices = @transform_1, window_bounds = array<i64: 1, 64, 128>}, {pipeline_mode = #tpu.pipeline_mode<synchronous>, transform_indices = @transform_2, window_bounds = array<i64: 128, 128>}, {pipeline_mode = #tpu.pipeline_mode<synchronous>, transform_indices = @transform_3, window_bounds = array<i64: 1, 128>}, {transform_indices = @transform_4, window_bounds = array<i64: 1, 64, 128>}]} {
    %c0_i32 = arith.constant 0 : i32
    %0 = arith.cmpi eq, %arg2, %c0_i32 : i32
    %1 = arith.extui %0 : i1 to i32
    %c0_i32_0 = arith.constant 0 : i32
    %2 = arith.cmpi ne, %1, %c0_i32_0 : i32
    scf.if %2 {
      %cst_26 = arith.constant 0xFF800000 : f32
      %35 = vector.broadcast %cst_26 : f32 to vector<64x1xf32>
      %c0_27 = arith.constant 0 : index
      %c0_28 = arith.constant 0 : index
      %36 = vector.load %arg8[%c0_27, %c0_28] : memref<64x1xf32, #tpu.memory_space<vmem>>, vector<64x1xf32>
      tpu.vector_store %arg8[%c0_27, %c0_28], %35 {strides = array<i32>} : memref<64x1xf32, #tpu.memory_space<vmem>>, vector<64x1xf32>,
      %cst_29 = arith.constant 0.000000e+00 : f32
      %37 = vector.broadcast %cst_29 : f32 to vector<64x1xf32>
      %c0_30 = arith.constant 0 : index
      %c0_31 = arith.constant 0 : index
      %38 = vector.load %arg9[%c0_30, %c0_31] : memref<64x1xf32, #tpu.memory_space<vmem>>, vector<64x1xf32>
      tpu.vector_store %arg9[%c0_30, %c0_31], %37 {strides = array<i32>} : memref<64x1xf32, #tpu.memory_space<vmem>>, vector<64x1xf32>,
      %cst_32 = arith.constant 0.000000e+00 : f32
      %39 = vector.broadcast %cst_32 : f32 to vector<64x128xf32>
      %c0_33 = arith.constant 0 : index
      %c0_34 = arith.constant 0 : index
      %40 = vector.load %arg10[%c0_33, %c0_34] : memref<64x128xf32, #tpu.memory_space<vmem>>, vector<64x128xf32>
      tpu.vector_store %arg10[%c0_33, %c0_34], %39 {strides = array<i32>} : memref<64x128xf32, #tpu.memory_space<vmem>>, vector<64x128xf32>,
    } else {
    }
    %c0 = arith.constant 0 : index
    %c0_1 = arith.constant 0 : index
    %c0_2 = arith.constant 0 : index
    %3 = vector.load %arg3[%c0, %c0_1, %c0_2] : memref<1x64x128xf32, #tpu.memory_space<vmem>>, vector<1x64x128xf32>
    %4 = vector.shape_cast %3 : vector<1x64x128xf32> to vector<64x128xf32>
    %c0_3 = arith.constant 0 : index
    %c0_4 = arith.constant 0 : index
    %c0_5 = arith.constant 0 : index
    %5 = vector.load %arg4[%c0_3, %c0_4, %c0_5] : memref<1x64x128xf32, #tpu.memory_space<vmem>>, vector<1x64x128xf32>
    %6 = vector.shape_cast %5 : vector<1x64x128xf32> to vector<64x128xf32>
    %cst = arith.constant dense<0.000000e+00> : vector<64x64xf32>
    %7 = tpu.matmul %4, %6, %cst {dimension_numbers = #tpu.dot_dimension_numbers<[1], [1], [0], [0], [0, 0, 1, 0], [], []>} : vector<64x128xf32>, vector<64x128xf32>, vector<64x64xf32> -> vector<64x64xf32>
    %c0_6 = arith.constant 0 : index
    %c0_7 = arith.constant 0 : index
    %8 = vector.load %arg8[%c0_6, %c0_7] : memref<64x1xf32, #tpu.memory_space<vmem>>, vector<64x1xf32>
    %cst_8 = arith.constant dense<0xFF800000> : vector<64xf32>
    %9 = vector.multi_reduction <maximumf>, %7, %cst_8 [1] : vector<64x64xf32> to vector<64xf32>
    %10 = vector.shape_cast %9 : vector<64xf32> to vector<64x1xf32>
    %11 = arith.maximumf %8, %10 : vector<64x1xf32>
    %12 = arith.subf %8, %11 : vector<64x1xf32>
    %13 = math.exp %12 : vector<64x1xf32>
    %14 = vector.broadcast %11 : vector<64x1xf32> to vector<64x64xf32>
    %15 = arith.subf %7, %14 : vector<64x64xf32>
    %16 = math.exp %15 : vector<64x64xf32>
    %c0_9 = arith.constant 0 : index
    %c0_10 = arith.constant 0 : index
    %17 = vector.load %arg5[%c0_9, %c0_10] : memref<128x128xf32, #tpu.memory_space<vmem>>, vector<128x128xf32>
    %cst_11 = arith.constant dense<0.000000e+00> : vector<64x128xf32>
    %18 = tpu.matmul %6, %17, %cst_11 {dimension_numbers = #tpu.dot_dimension_numbers<[1], [0], [0], [1], [0, 0, 1, 1], [], []>} : vector<64x128xf32>, vector<128x128xf32>, vector<64x128xf32> -> vector<64x128xf32>
    %c0_12 = arith.constant 0 : index
    %c0_13 = arith.constant 0 : index
    %19 = vector.load %arg9[%c0_12, %c0_13] : memref<64x1xf32, #tpu.memory_space<vmem>>, vector<64x1xf32>
    %20 = arith.mulf %13, %19 : vector<64x1xf32>
    %cst_14 = arith.constant dense<0.000000e+00> : vector<64xf32>
    %21 = vector.multi_reduction <add>, %16, %cst_14 [1] : vector<64x64xf32> to vector<64xf32>
    %22 = vector.shape_cast %21 : vector<64xf32> to vector<64x1xf32>
    %23 = arith.addf %20, %22 : vector<64x1xf32>
    %c0_15 = arith.constant 0 : index
    %c0_16 = arith.constant 0 : index
    %24 = vector.load %arg9[%c0_15, %c0_16] : memref<64x1xf32, #tpu.memory_space<vmem>>, vector<64x1xf32>
    tpu.vector_store %arg9[%c0_15, %c0_16], %23 {strides = array<i32>} : memref<64x1xf32, #tpu.memory_space<vmem>>, vector<64x1xf32>,
    %c0_17 = arith.constant 0 : index
    %c0_18 = arith.constant 0 : index
    %25 = vector.load %arg10[%c0_17, %c0_18] : memref<64x128xf32, #tpu.memory_space<vmem>>, vector<64x128xf32>
    %26 = vector.broadcast %13 : vector<64x1xf32> to vector<64x128xf32>
    %27 = arith.mulf %26, %25 : vector<64x128xf32>
    %cst_19 = arith.constant dense<0.000000e+00> : vector<64x128xf32>
    %28 = tpu.matmul %16, %18, %cst_19 {dimension_numbers = #tpu.dot_dimension_numbers<[1], [0], [0], [1], [0, 0, 1, 1], [], []>} : vector<64x64xf32>, vector<64x128xf32>, vector<64x128xf32> -> vector<64x128xf32>
    %29 = arith.addf %27, %28 : vector<64x128xf32>
    %c0_20 = arith.constant 0 : index
    %c0_21 = arith.constant 0 : index
    %30 = vector.load %arg10[%c0_20, %c0_21] : memref<64x128xf32, #tpu.memory_space<vmem>>, vector<64x128xf32>
    tpu.vector_store %arg10[%c0_20, %c0_21], %29 {strides = array<i32>} : memref<64x128xf32, #tpu.memory_space<vmem>>, vector<64x128xf32>,
    %c0_22 = arith.constant 0 : index
    %c0_23 = arith.constant 0 : index
    %31 = vector.load %arg8[%c0_22, %c0_23] : memref<64x1xf32, #tpu.memory_space<vmem>>, vector<64x1xf32>
    tpu.vector_store %arg8[%c0_22, %c0_23], %11 {strides = array<i32>} : memref<64x1xf32, #tpu.memory_space<vmem>>, vector<64x1xf32>,
    %c0_i32_24 = arith.constant 0 : i32
    %32 = arith.cmpi eq, %arg2, %c0_i32_24 : i32
    %33 = arith.extui %32 : i1 to i32
    %c0_i32_25 = arith.constant 0 : i32
    %34 = arith.cmpi ne, %33, %c0_i32_25 : i32
    scf.if %34 {
      %c0_26 = arith.constant 0 : index
      %c0_27 = arith.constant 0 : index
      %35 = vector.load %arg9[%c0_26, %c0_27] : memref<64x1xf32, #tpu.memory_space<vmem>>, vector<64x1xf32>
      %36 = tpu.reciprocal %35 {approx = true} : vector<64x1xf32> -> vector<64x1xf32>
      %c0_28 = arith.constant 0 : index
      %c0_29 = arith.constant 0 : index
      %37 = vector.load %arg10[%c0_28, %c0_29] : memref<64x128xf32, #tpu.memory_space<vmem>>, vector<64x128xf32>
      %38 = vector.broadcast %36 : vector<64x1xf32> to vector<64x128xf32>
      %39 = arith.mulf %37, %38 : vector<64x128xf32>
      %c0_30 = arith.constant 0 : index
      %c0_31 = arith.constant 0 : index
      %40 = vector.load %arg6[%c0_30, %c0_31] : memref<1x128xf32, #tpu.memory_space<vmem>>, vector<1x128xf32>
      %41 = vector.broadcast %40 : vector<1x128xf32> to vector<64x128xf32>
      %42 = arith.addf %39, %41 : vector<64x128xf32>
      %43 = arith.addf %42, %4 : vector<64x128xf32>
      %c0_32 = arith.constant 0 : index
      %c0_33 = arith.constant 0 : index
      %c0_34 = arith.constant 0 : index
      %44 = vector.load %arg7[%c0_32, %c0_33, %c0_34] : memref<1x64x128xf32, #tpu.memory_space<vmem>>, vector<1x64x128xf32>
      %45 = vector.shape_cast %44 : vector<1x64x128xf32> to vector<64x128xf32>
      %46 = vector.shape_cast %43 : vector<64x128xf32> to vector<1x64x128xf32>
      tpu.vector_store %arg7[%c0_32, %c0_33, %c0_34], %46 {strides = array<i32>} : memref<1x64x128xf32, #tpu.memory_space<vmem>>, vector<1x64x128xf32>,
    } else {
    }
    return
  }
  func.func @transform_0(%arg0: i32, %arg1: i32, %arg2: i32) -> (i32, i32, i32) {
    %c0_i32 = arith.constant 0 : i32
    %c0_i32_0 = arith.constant 0 : i32
    return %arg0, %arg1, %c0_i32 : i32, i32, i32
  }
  func.func @transform_1(%arg0: i32, %arg1: i32, %arg2: i32) -> (i32, i32, i32) {
    %c0_i32 = arith.constant 0 : i32
    %c0_i32_0 = arith.constant 0 : i32
    return %arg0, %arg2, %c0_i32 : i32, i32, i32
  }
  func.func @transform_2(%arg0: i32, %arg1: i32, %arg2: i32) -> (i32, i32) {
    %c0_i32 = arith.constant 0 : i32
    %c0_i32_0 = arith.constant 0 : i32
    %c0_i32_1 = arith.constant 0 : i32
    return %c0_i32, %c0_i32_0 : i32, i32
  }
  func.func @transform_3(%arg0: i32, %arg1: i32, %arg2: i32) -> (i32, i32) {
    %c0_i32 = arith.constant 0 : i32
    %c0_i32_0 = arith.constant 0 : i32
    %c0_i32_1 = arith.constant 0 : i32
    return %c0_i32, %c0_i32_0 : i32, i32
  }
  func.func @transform_4(%arg0: i32, %arg1: i32, %arg2: i32) -> (i32, i32, i32) {
    %c0_i32 = arith.constant 0 : i32
    %c0_i32_0 = arith.constant 0 : i32
    return %arg0, %arg1, %c0_i32 : i32, i32, i32
  }
}

</mosaic_0001>

<bundles_post_ra>
// kernel: nonlocal_block_pallas.1
= control target key start
LH: loop header
LB: loop body
LE: loop exit
PB: predicated region body
PF: predicated region fallthrough
CT: control target
= control target key end

     0   :  { %s1144_s15 = smov 0   ;;  %s1146_s16 = smov 0   ;;  %s1467_s0 = inlined_call_operand.vmem [shape: f32[2,64,128], index: 0, kind: input, shape index: {}, may-alias: {0,1}]   ;;  %s1468_s1 = inlined_call_operand.vmem [shape: f32[2,64,128], index: 1, kind: input, shape index: {}, may-alias: {0,1}]   ;;  %s1469_s2 = inlined_call_operand.vmem [shape: f32[128,128], index: 2, kind: input, shape index: {}]   ;;  %s1470_s3 = inlined_call_operand.vmem [shape: f32[1,128], index: 3, kind: input, shape index: {}]   ;;  %s1471_s4 = inlined_call_operand.vmem [shape: f32[2,64,128], index: 4, kind: output, shape index: {}]  }
   0x1   :  { %s1148_s17 = smov 0  }
   0x2 LB: > { %s33_s18 = sadd.s32 1, %s1110_s16  ;;  %p969_p0 = scmp.ge.s32.totalorder %s1114_s17, 1  ;;  %s1114_s17 = sphi %s1148_s17, %s14_s17   ;;  %s1110_s16 = sphi %s1146_s16, %s1473_s16   ;;  %s1106_s15 = sphi %s1144_s15, %s1472_s15  }
   0x3   : > { %p35_p1 = scmp.ge.s32.totalorder %s33_s18, 2  ;;  %p207_p2 = scmp.lt.s32.totalorder %s1114_s17, 3 }
   0x5   : > { %s1475_s18 = smov (%p35_p1, %s33_s18), 0  ;;  %p208_p3 = pnand %p969_p0, %p207_p2 }
   0x6   : > { %p251_p4 = scmp.lt.s32.totalorder (!%p208_p3), %s1106_s15, 1 }
   0x7   : > { %211 = sbr.rel (%p208_p3) target bundleno = 730 (0x2da), region = 36 }
   0xc   : > { %s1477_s15 = smov (!%p251_p4, %s1106_s15), 1  ;;  %vm374_vm0 = vcmask 523264   ;;  %v510_v18 = vld [vmem:[%s1469_s2 + $0x78] sm:$0xff]  ;;  %v509_v19 = vld [vmem:[%s1469_s2 + $0x70] sm:$0xff]  ;;  %v508_v21 = vld [vmem:[%s1469_s2 + $0x68] sm:$0xff]  ;;  %vm284_vm1 = vcmask 7168  }
   0xd   : > { %s1162_s19 = sshll.u32 %s1477_s15, 6  ;;  %511 = vmatpush.msra.mxu1 %v510_v18  ;;  %v507_v23 = vld [vmem:[%s1469_s2 + $0x60] sm:$0xff]  ;;  %v506_v24 = vld [vmem:[%s1469_s2 + $0x58] sm:$0xff]  ;;  %v505_v25 = vld [vmem:[%s1469_s2 + $0x50] sm:$0xff]  ;;  %v1116_v48 = vmov -inf   ;;  %v1117_v49 = vmov 0  }
   0xe   : > { %s268_s22 = scalar_lea.vmem %s1468_s1, %s1162_s19  ;;  %s258_s25 = scalar_lea.vmem %s1467_s0, %s1162_s19  ;;  %v504_v26 = vld [vmem:[%s1469_s2 + $0x48] sm:$0xff]  ;;  %v503_v29 = vld [vmem:[%s1469_s2 + $0x40] sm:$0xff]  ;;  %v502_v30 = vld [vmem:[%s1469_s2 + $0x38] sm:$0xff]  ;;  %285 = vst.msk [vmem:[#allocation2] sm:$0xff] %vm284_vm1, %v1116_v48  ;;  %1040 = vset.pattern.permute.xlu0 %v1117_v49  ;;  %1041 = vset.pattern.permute.xlu2 %v1117_v49  ;;  %v1118_v50 = vmov 0.0  }
   0xf   : > { %v1168_v0 = vld [vmem:[%s268_s22 + $0x38] sm:$0xff]  ;;  %v1172_v1 = vld [vmem:[%s268_s22 + $0x30] sm:$0xff]  ;;  %v1176_v2 = vld [vmem:[%s268_s22 + $0x28] sm:$0xff]  ;;  %512 = vmatpush.msra.mxu1 %v509_v19  ;;  %286 = vst.msk [vmem:[#allocation2 + $0x8] sm:$0xff] %vm284_vm1, %v1116_v48  ;;  %1042 = vset.pattern.permute.xlu1 %v1117_v49  ;;  %s1434_s14 = scalar_lea.vmem %s1471_s4, %s1162_s19 }
  0x10   : > { %333 = vmatpush.xpose.msra.mxu0 %v1168_v0  ;;  %989 = vmatpush.xpose.msra.mxu3 %v1168_v0  ;;  %v1180_v3 = vld [vmem:[%s268_s22 + $0x20] sm:$0xff]  ;;  %v1184_v4 = vld [vmem:[%s268_s22 + $0x18] sm:$0xff]  ;;  %v1188_v5 = vld [vmem:[%s268_s22 + $0x10] sm:$0xff]  ;;  %287 = vst.msk [vmem:[#allocation2 + $0x10] sm:$0xff] %vm284_vm1, %v1116_v48 }
  0x11   : > { %v1192_v6 = vld [vmem:[%s268_s22 + $0x8] sm:$0xff]  ;;  %v1196_v7 = vld [vmem:[%s268_s22] sm:$0xff]  ;;  %v1206_v9 = vld [vmem:[%s258_s25 + $0x30] sm:$0xff]  ;;  %513 = vmatpush.msra.mxu1 %v508_v21  ;;  %288 = vst.msk [vmem:[#allocation2 + $0x18] sm:$0xff] %vm284_vm1, %v1116_v48 }
  0x12   : > { %v1203_v8 = vld [vmem:[%s258_s25] sm:$0xff]  ;;  %v1210_v10 = vld [vmem:[%s258_s25 + $0x8] sm:$0xff]  ;;  %v1212_v11 = vld [vmem:[%s258_s25 + $0x38] sm:$0xff]  ;;  %289 = vst.msk [vmem:[#allocation2 + $0x20] sm:$0xff] %vm284_vm1, %v1116_v48 }
  0x13   : > { %v1216_v12 = vld [vmem:[%s258_s25 + $0x10] sm:$0xff]  ;;  %v1219_v13 = vld [vmem:[%s258_s25 + $0x18] sm:$0xff]  ;;  %v1222_v14 = vld [vmem:[%s258_s25 + $0x20] sm:$0xff]  ;;  %514 = vmatpush.msra.mxu1 %v507_v23  ;;  %290 = vst.msk [vmem:[#allocation2 + $0x28] sm:$0xff] %vm284_vm1, %v1116_v48 }
  0x14   : > { %334 = vmatpush.xpose.msra.mxu0 %v1172_v1  ;;  %990 = vmatpush.xpose.msra.mxu3 %v1172_v1  ;;  %v1225_v15 = vld [vmem:[%s258_s25 + $0x28] sm:$0xff]  ;;  %v501_v31 = vld [vmem:[%s1469_s2 + $0x30] sm:$0xff]  ;;  %v499_v35 = vld [vmem:[%s1469_s2 + $0x20] sm:$0xff]  ;;  %291 = vst.msk [vmem:[#allocation2 + $0x30] sm:$0xff] %vm284_vm1, %v1116_v48 }
  0x15   : > { %515 = vmatpush.msra.mxu1 %v506_v24  ;;  %v500_v32 = vld [vmem:[%s1469_s2 + $0x28] sm:$0xff]  ;;  %v498_v37 = vld [vmem:[%s1469_s2 + $0x18] sm:$0xff]  ;;  %v497_v38 = vld [vmem:[%s1469_s2 + $0x10] sm:$0xff]  ;;  %292 = vst.msk [vmem:[#allocation2 + $0x38] sm:$0xff] %vm284_vm1, %v1116_v48 }
  0x16   : > { %v496_v41 = vld [vmem:[%s1469_s2 + $0x8] sm:$0xff]  ;;  %v495_v43 = vld [vmem:[%s1469_s2] sm:$0xff]  ;;  %293 = vst.msk [vmem:[#allocation3] sm:$0xff] %vm284_vm1, %v1118_v50 }
  0x17   : > { %516 = vmatpush.msra.mxu1 %v505_v25  ;;  %294 = vst.msk [vmem:[#allocation3 + $0x8] sm:$0xff] %vm284_vm1, %v1118_v50  ;;  %v366_v51 = vld [vmem:[#allocation2] sm:$0xff]  ;;  %v367_v54 = vld [vmem:[#allocation2 + $0x8] sm:$0xff]  ;;  %v368_v57 = vld [vmem:[#allocation2 + $0x10] sm:$0xff] }
  0x18   : > { %335 = vmatpush.xpose.msra.mxu0 %v1176_v2  ;;  %991 = vmatpush.xpose.msra.mxu3 %v1176_v2  ;;  %295 = vst.msk [vmem:[#allocation3 + $0x10] sm:$0xff] %vm284_vm1, %v1118_v50  ;;  %v369_v60 = vld [vmem:[#allocation2 + $0x18] sm:$0xff] }
  0x19   : > { %517 = vmatpush.msra.mxu1 %v504_v26  ;;  %296 = vst.msk [vmem:[#allocation3 + $0x18] sm:$0xff] %vm284_vm1, %v1118_v50 }
  0x1a   : > { %297 = vst.msk [vmem:[#allocation3 + $0x20] sm:$0xff] %vm284_vm1, %v1118_v50 }
  0x1b   : > { %518 = vmatpush.msra.mxu1 %v503_v29  ;;  %298 = vst.msk [vmem:[#allocation3 + $0x28] sm:$0xff] %vm284_vm1, %v1118_v50  ;;  %v372_v63 = vld [vmem:[#allocation2 + $0x30] sm:$0xff] }
  0x1c   : > { %336 = vmatpush.xpose.msra.mxu0 %v1180_v3  ;;  %992 = vmatpush.xpose.msra.mxu3 %v1180_v3  ;;  %299 = vst.msk [vmem:[#allocation3 + $0x30] sm:$0xff] %vm284_vm1, %v1118_v50 }
  0x1d   : > { %519 = vmatpush.msra.mxu1 %v502_v30  ;;  %300 = vst.msk [vmem:[#allocation3 + $0x38] sm:$0xff] %vm284_vm1, %v1118_v50 }
  0x1f   : > { %520 = vmatpush.msra.mxu1 %v501_v31 }
  0x20   : > { %337 = vmatpush.xpose.msra.mxu0 %v1184_v4  ;;  %993 = vmatpush.xpose.msra.mxu3 %v1184_v4 }
  0x21   : > { %521 = vmatpush.msra.mxu1 %v500_v32 }
  0x23   : > { %522 = vmatpush.msra.mxu1 %v499_v35 }
  0x24   : > { %338 = vmatpush.xpose.msra.mxu0 %v1188_v5  ;;  %994 = vmatpush.xpose.msra.mxu3 %v1188_v5 }
  0x25   : > { %523 = vmatpush.msra.mxu1 %v498_v37 }
  0x27   : > { %524 = vmatpush.msra.mxu1 %v497_v38 }
  0x28   : > { %339 = vmatpush.xpose.msra.mxu0 %v1192_v6  ;;  %995 = vmatpush.xpose.msra.mxu3 %v1192_v6 }
  0x29   : > { %525 = vmatpush.msra.mxu1 %v496_v41 }
  0x2b   : > { %526 = vmatpush.msra.mxu1 %v495_v43 }
  0x2c   : > { %340 = vmatpush.xpose.msra.mxu0 %v1196_v7  ;;  %996 = vmatpush.xpose.msra.mxu3 %v1196_v7 }
  0x2d   : > { %527 = vmatmul.f32.vlgmr.msra.gmra.mxu1 %v1196_v7 }
  0x2f   : > { %341 = vmatmul.f32.vlgmr.msra.gmra.mxu0 %v1203_v8  ;;  %359 = vmatmul.f32.vlgmr.msra.gmra.mxu3 %v1206_v9 }
  0x30   : > { %997 = vmatpush.msrb.mxu3 %v510_v18  ;;  %v1338_v18 = vld [vmem:[#allocation2 + $0x38] sm:$0xff] }
  0x32   : > { %998 = vmatpush.msrb.mxu3 %v509_v19  ;;  %v371_v19 = vld [vmem:[#allocation2 + $0x28] sm:$0xff] }
  0x34   : > { %999 = vmatpush.msrb.mxu3 %v508_v21 }
  0x35   : > { %530 = vmatmul.f32.gmra.mxu1 %v1192_v6 }
  0x36   : > { %1000 = vmatpush.msrb.mxu3 %v507_v23 }
  0x37   : > { %344 = vmatmul.f32.gmra.mxu0 %v1210_v10  ;;  %362 = vmatmul.f32.gmra.mxu3 %v1212_v11 }
  0x38   : > { %1001 = vmatpush.msrb.mxu3 %v506_v24 }
  0x3a   : > { %1002 = vmatpush.msrb.mxu3 %v505_v25 }
  0x3c   : > { %1003 = vmatpush.msrb.mxu3 %v504_v26 }
  0x3d   : > { %533 = vmatmul.f32.gmra.mxu1 %v1188_v5 }
  0x3e   : > { %1004 = vmatpush.msrb.mxu3 %v503_v29 }
  0x3f   : > { %347 = vmatmul.f32.gmra.mxu0 %v1216_v12 }
  0x40   : > { %1005 = vmatpush.msrb.mxu3 %v502_v30 }
  0x42   : > { %1006 = vmatpush.msrb.mxu3 %v501_v31 }
  0x44   : > { %1007 = vmatpush.msrb.mxu3 %v500_v32 }
  0x45   : > { %536 = vmatmul.f32.gmra.mxu1 %v1184_v4 }
  0x46   : > { %1008 = vmatpush.msrb.mxu3 %v499_v35 }
  0x47   : > { %350 = vmatmul.f32.gmra.mxu0 %v1219_v13 }
  0x48   : > { %1009 = vmatpush.msrb.mxu3 %v498_v37 }
  0x4a   : > { %1010 = vmatpush.msrb.mxu3 %v497_v38 }
  0x4c   : > { %1011 = vmatpush.msrb.mxu3 %v496_v41 }
  0x4d   : > { %539 = vmatmul.f32.gmra.mxu1 %v1180_v3 }
  0x4e   : > { %1012 = vmatpush.msrb.mxu3 %v495_v43 }
  0x4f   : > { %353 = vmatmul.f32.gmra.mxu0 %v1222_v14  ;;  %545 = vmatmul.f32.vlgmr.msrb.gmra.mxu3 %v1172_v1 }
  0x55   : > { %542 = vmatmul.f32.gmra.mxu1 %v1176_v2 }
  0x57   : > { %356 = vmatmul.f32.gmra.mxu0 %v1225_v15  ;;  %548 = vmatmul.f32.gmra.mxu3 %v1168_v0  ;;  %v370_v0 = vld [vmem:[#allocation2 + $0x20] sm:$0xff] }
  0xac   : > { %v1228_v16 = vpop.f32.mrf.mxu0 }
  0xad   : > { %v375_v17 = vsel %vm374_vm0, %v1228_v16, -inf }
  0xae   : > { %376 = vmax.xlane.f32.xlu0 %v375_v17 }
  0xb2   : > { %v1280_v36 = vpop.f32.mrf.mxu3 }
  0xb3   : > { %v393_v39 = vsel %vm374_vm0, %v1280_v36, -inf }
  0xb4   : > { %v1238_v20 = vpop.f32.mrf.mxu0 }
  0xb5   : > { %v378_v22 = vsel %vm374_vm0, %v1238_v20, -inf }
  0xb6   : > { %379 = vmax.xlane.f32.xlu0 %v378_v22 }
  0xba   : > { %v1300_v44 = vpop.f32.mrf.mxu3 }
  0xbb   : > { %v396_v45 = vsel %vm374_vm0, %v1300_v44, -inf }
  0xbc   : > { %v1257_v27 = vpop.f32.mrf.mxu0 }
  0xbd   : > { %v381_v28 = vsel %vm374_vm0, %v1257_v27, -inf }
  0xbe   : > { %382 = vmax.xlane.f32.xlu1 %v381_v28 }
  0xc4   : > { %v1273_v33 = vpop.f32.mrf.mxu0 }
  0xc5   : > { %v384_v34 = vsel %vm374_vm0, %v1273_v33, -inf }
  0xc6   : > { %385 = vmax.xlane.f32.xlu1 %v384_v34  ;;  %v528_v34 = vpop.f32.mrf.mxu1 }
  0xcc   : > { %v1290_v40 = vpop.f32.mrf.mxu0 }
  0xcd   : > { %v387_v42 = vsel %vm374_vm0, %v1290_v40, -inf }
  0xce   : > { %394 = vmax.xlane.f32.xlu1 %v393_v39  ;;  %388 = vmax.xlane.f32.xlu2 %v387_v42  ;;  %v531_v43 = vpop.f32.mrf.mxu1 }
  0xd4   : > { %v1306_v46 = vpop.f32.mrf.mxu0 }
  0xd5   : > { %v390_v47 = vsel %vm374_vm0, %v1306_v46, -inf }
  0xd6   : > { %397 = vmax.xlane.f32.xlu1 %v396_v45  ;;  %391 = vmax.xlane.f32.xlu2 %v390_v47  ;;  %v534_v50 = vpop.f32.mrf.mxu1 }
 0x121   : > { %v377_v52 = vpop.xlane.xlu0 %376 }
 0x122   : > { %v399_v53 = vmax.f32 %v366_v51, %v377_v52  ;;  %v537_v52 = vpop.f32.mrf.mxu1 }
 0x124   : > { %746 = vst.msk [vmem:[#allocation2] sm:$0xff] %vm284_vm1, %v399_v53  ;;  %433 = vperm.xlu0 %1040, %v399_v53   ;;  %v407_v5 = vsub.f32 %v366_v51, %v399_v53  ;;  %v546_v53 = vpop.f32.mrf.mxu3 }
 0x126   : > { %v415_v17 = vmul.f32 1.442695, %v407_v5 }
 0x128   : > { %1044 = vpow2.f32 %v415_v17 }
 0x129   : > { %v380_v55 = vpop.xlane.xlu0 %379 }
 0x12a   : > { %v400_v56 = vmax.f32 %v367_v54, %v380_v55 }
 0x12c   : > { %747 = vst.msk [vmem:[#allocation2 + $0x8] sm:$0xff] %vm284_vm1, %v400_v56  ;;  %438 = vperm.xlu2 %1041, %v400_v56   ;;  %v408_v6 = vsub.f32 %v367_v54, %v400_v56  ;;  %v540_v54 = vpop.f32.mrf.mxu1  ;;  %v549_v55 = vpop.f32.mrf.mxu3 }
 0x12d   : > { %697 = vmatpush.msra.mxu2 %v549_v55 }
 0x12e   : > { %v417_v21 = vmul.f32 1.442695, %v408_v6  ;;  %v1349_v37 = vpop.eup %1044 }
 0x12f   : > { %698 = vmatpush.msra.mxu2 %v546_v53 }
 0x130   : > { %1046 = vpow2.f32 %v417_v21 }
 0x131   : > { %v383_v58 = vpop.xlane.xlu1 %382 }
 0x132   : > { %v401_v59 = vmax.f32 %v368_v57, %v383_v58 }
 0x134   : > { %748 = vst.msk [vmem:[#allocation2 + $0x10] sm:$0xff] %vm284_vm1, %v401_v59  ;;  %443 = vperm.xlu1 %1042, %v401_v59   ;;  %v409_v7 = vsub.f32 %v368_v57, %v401_v59  ;;  %v543_v56 = vpop.f32.mrf.mxu1 }
 0x135   : > { %699 = vmatpush.msra.mxu2 %v543_v56  ;;  %v552_v56 = vld [vmem:[#allocation3] sm:$0xff] }
 0x136   : > { %v419_v24 = vmul.f32 1.442695, %v409_v7  ;;  %v1351_v39 = vpop.eup %1046 }
 0x137   : > { %700 = vmatpush.msra.mxu2 %v540_v54 }
 0x138   : > { %1048 = vpow2.f32 %v419_v24 }
 0x139   : > { %v386_v61 = vpop.xlane.xlu1 %385  ;;  %701 = vmatpush.msra.mxu2 %v537_v52 }
 0x13a   : > { %v402_v62 = vmax.f32 %v369_v60, %v386_v61 }
 0x13b   : > { %702 = vmatpush.msra.mxu2 %v534_v50 }
 0x13c   : > { %749 = vst.msk [vmem:[#allocation2 + $0x18] sm:$0xff] %vm284_vm1, %v402_v62  ;;  %448 = vperm.xlu2 %1041, %v402_v62   ;;  %v410_v31 = vsub.f32 %v369_v60, %v402_v62 }
 0x13d   : > { %703 = vmatpush.msra.mxu2 %v531_v43 }
 0x13e   : > { %v421_v38 = vmul.f32 1.442695, %v410_v31  ;;  %v1353_v41 = vpop.eup %1048 }
 0x13f   : > { %704 = vmatpush.msra.mxu2 %v528_v34 }
 0x141   : > { %v395_v1 = vpop.xlane.xlu1 %394  ;;  %v389_v2 = vpop.xlane.xlu2 %388 }
 0x142   : > { %v405_v3 = vmax.f32 %v372_v63, %v395_v1  ;;  %v403_v4 = vmax.f32 %v370_v0, %v389_v2 }
 0x144   : > { %752 = vst.msk [vmem:[#allocation2 + $0x30] sm:$0xff] %vm284_vm1, %v405_v3  ;;  %453 = vperm.xlu2 %1041, %v403_v4   ;;  %v411_v28 = vsub.f32 %v370_v0, %v403_v4  ;;  %v413_v42 = vsub.f32 %v372_v63, %v405_v3 }
 0x145   : > { %750 = vst.msk [vmem:[#allocation2 + $0x20] sm:$0xff] %vm284_vm1, %v403_v4 }
 0x146   : > { %v423_v35 = vmul.f32 1.442695, %v411_v28  ;;  %v427_v47 = vmul.f32 1.442695, %v413_v42 }
 0x149   : > { %v398_v22 = vpop.xlane.xlu1 %397  ;;  %v392_v23 = vpop.xlane.xlu2 %391 }
 0x14a   : > { %v1341_v25 = vmax.f32 %v1338_v18, %v398_v22  ;;  %v404_v26 = vmax.f32 %v371_v19, %v392_v23 }
 0x14c   : > { %v414_v29 = vsub.f32 %v1338_v18, %v1341_v25  ;;  %753 = vst.msk [vmem:[#allocation2 + $0x38] sm:$0xff] %vm284_vm1, %v1341_v25  ;;  %v412_v30 = vsub.f32 %v371_v19, %v404_v26  ;;  %468 = vperm.xlu1 %1042, %v1341_v25   ;;  %463 = vperm.xlu2 %1041, %v405_v3  }
 0x14d   : > { %751 = vst.msk [vmem:[#allocation2 + $0x28] sm:$0xff] %vm284_vm1, %v404_v26  ;;  %458 = vperm.xlu0 %1040, %v404_v26  }
 0x14e   : > { %v425_v32 = vmul.f32 1.442695, %v412_v30  ;;  %v429_v50 = vmul.f32 1.442695, %v414_v29 }
 0x150   : > { %1050 = vpow2.f32 %v425_v32 }
 0x151   : > { %1052 = vpow2.f32 %v423_v35 }
 0x152   : > { %1054 = vpow2.f32 %v421_v38 }
 0x153   : > { %1056 = vpow2.f32 %v427_v47 }
 0x154   : > { %619 = vperm.xlu1 %1042, %v1349_v37   ;;  %624 = vperm.xlu2 %1041, %v1351_v39  }
 0x155   : > { %629 = vperm.xlu0 %1040, %v1353_v41  }
 0x156   : > { %v1358_v45 = vpop.eup %1050 }
 0x157   : > { %v1360_v48 = vpop.eup %1052 }
 0x158   : > { %v1362_v49 = vpop.eup %1054 }
 0x159   : > { %v1367_v51 = vpop.eup %1056 }
 0x15c   : > { %634 = vperm.xlu1 %1042, %v1362_v49   ;;  %644 = vperm.xlu2 %1041, %v1358_v45  }
 0x15d   : > { %639 = vperm.xlu0 %1040, %v1360_v48  }
 0x164   : > { %649 = vperm.xlu1 %1042, %v1367_v51  }
 0x186   : > { %v439_v57 = vpop.permute.xlu2 %438 }
 0x187   : > { %v472_v62 = vsub.f32 %v1238_v20, %v439_v57 }
 0x189   : > { %v481_v0 = vmul.f32 1.442695, %v472_v62  ;;  %v554_v62 = vld [vmem:[#allocation3 + $0x10] sm:$0xff] }
 0x196   : > { %v434_v58 = vpop.permute.xlu0 %433  ;;  %v449_v59 = vpop.permute.xlu2 %448 }
 0x197   : > { %v471_v60 = vsub.f32 %v1228_v16, %v434_v58  ;;  %v474_v20 = vsub.f32 %v1273_v33, %v449_v59  ;;  %v560_v59 = vmul.f32 %v1349_v37, %v552_v56 }
 0x199   : > { %v479_v61 = vmul.f32 1.442695, %v471_v60  ;;  %v485_v19 = vmul.f32 1.442695, %v474_v20 }
 0x19b   : > { %1058 = vpow2.f32 %v479_v61 }
 0x19c   : > { %1060 = vpow2.f32 %v481_v0  ;;  %v562_v0 = vmul.f32 %v1353_v41, %v554_v62  ;;  %v555_v41 = vld [vmem:[#allocation3 + $0x18] sm:$0xff] }
 0x19e   : > { %v454_v63 = vpop.permute.xlu2 %453 }
 0x1a1   : > { %v1059_v1 = vpop.eup %1058 }
 0x1a2   : > { %976 = vmatmul.msk.f32.vlgmr.msra.gmra.mxu2 %vm374_vm0, %v1059_v1  ;;  %v568_v2 = vsel %vm374_vm0, %v1059_v1, 0.0  ;;  %v1061_v16 = vpop.eup %1060 }
 0x1a3   : > { %569 = vadd.xlane.f32.xlu0 %v568_v2  ;;  %v571_v33 = vsel %vm374_vm0, %v1061_v16, 0.0 }
 0x1a6   : > { %v444_v3 = vpop.permute.xlu1 %443  ;;  %v464_v4 = vpop.permute.xlu2 %463 }
 0x1a7   : > { %v473_v5 = vsub.f32 %v1257_v27, %v444_v3  ;;  %v477_v6 = vsub.f32 %v1280_v36, %v464_v4  ;;  %v475_v27 = vsub.f32 %v1290_v40, %v454_v63  ;;  %v558_v63 = vld [vmem:[#allocation3 + $0x30] sm:$0xff] }
 0x1a8   : > { %v566_v2 = vmul.f32 %v1367_v51, %v558_v63  ;;  %v563_v51 = vmul.f32 %v1362_v49, %v555_v41 }
 0x1a9   : > { %v483_v7 = vmul.f32 1.442695, %v473_v5  ;;  %v491_v17 = vmul.f32 1.442695, %v477_v6  ;;  %v487_v24 = vmul.f32 1.442695, %v475_v27 }
 0x1aa   : > { %977 = vmatmul.msk.f32.gmra.mxu2 %vm374_vm0, %v1061_v16  ;;  %v553_v6 = vld [vmem:[#allocation3 + $0x8] sm:$0xff]  ;;  %v559_v27 = vld [vmem:[#allocation3 + $0x38] sm:$0xff] }
 0x1ab   : > { %1062 = vpow2.f32 %v483_v7  ;;  %v561_v16 = vmul.f32 %v1351_v39, %v553_v6 }
 0x1ac   : > { %1064 = vpow2.f32 %v491_v17 }
 0x1ad   : > { %1066 = vpow2.f32 %v485_v19 }
 0x1ae   : > { %1068 = vpow2.f32 %v487_v24  ;;  %v1405_v58 = vpop.permute.xlu2 %624 }
 0x1b1   : > { %v1063_v21 = vpop.eup %1062 }
 0x1b2   : > { %v1065_v22 = vpop.eup %1064  ;;  %978 = vmatmul.msk.f32.gmra.mxu2 %vm374_vm0, %v1063_v21  ;;  %v574_v23 = vsel %vm374_vm0, %v1063_v21, 0.0 }
 0x1b3   : > { %575 = vadd.xlane.f32.xlu1 %v574_v23  ;;  %v586_v36 = vsel %vm374_vm0, %v1065_v22, 0.0  ;;  %v1067_v26 = vpop.eup %1066 }
 0x1b4   : > { %587 = vadd.xlane.f32.xlu2 %v586_v36  ;;  %v1069_v34 = vpop.eup %1068  ;;  %v577_v38 = vsel %vm374_vm0, %v1067_v26, 0.0  ;;  %v557_v36 = vld [vmem:[#allocation3 + $0x28] sm:$0xff] }
 0x1b5   : > { %v565_v24 = vmul.f32 %v1358_v45, %v557_v36 }
 0x1b6   : > { %v1411_v25 = vpop.permute.xlu2 %644 }
 0x1ba   : > { %979 = vmatmul.msk.f32.gmra.mxu2 %vm374_vm0, %v1067_v26 }
 0x1bc   : > { %572 = vadd.xlane.f32.xlu2 %v571_v33 }
 0x1be   : > { %v469_v28 = vpop.permute.xlu1 %468 }
 0x1bf   : > { %v478_v30 = vsub.f32 %v1300_v44, %v469_v28  ;;  %v459_v31 = vpop.permute.xlu0 %458 }
 0x1c0   : > { %v476_v32 = vsub.f32 %v1306_v46, %v459_v31  ;;  %v580_v46 = vsel %vm374_vm0, %v1069_v34, 0.0 }
 0x1c1   : > { %v493_v40 = vmul.f32 1.442695, %v478_v30 }
 0x1c2   : > { %v489_v35 = vmul.f32 1.442695, %v476_v32  ;;  %980 = vmatmul.msk.f32.gmra.mxu2 %vm374_vm0, %v1069_v34  ;;  %v556_v32 = vld [vmem:[#allocation3 + $0x20] sm:$0xff] }
 0x1c3   : > { %1070 = vpow2.f32 %v493_v40  ;;  %v564_v34 = vmul.f32 %v1360_v48, %v556_v32 }
 0x1c4   : > { %1072 = vpow2.f32 %v489_v35  ;;  %578 = vadd.xlane.f32.xlu2 %v577_v38 }
 0x1c5   : > { %1074 = vpow2.f32 %v429_v50 }
 0x1c6   : > { %v1399_v54 = vpop.permute.xlu1 %619 }
 0x1c7   : > { %v1397_v53 = vpop.permute.xlu0 %629 }
 0x1c9   : > { %v1071_v42 = vpop.eup %1070 }
 0x1ca   : > { %v1073_v43 = vpop.eup %1072  ;;  %v589_v47 = vsel %vm374_vm0, %v1071_v42, 0.0 }
 0x1cb   : > { %981 = vmatmul.msk.f32.gmra.mxu2 %vm374_vm0, %v1073_v43  ;;  %590 = vadd.xlane.f32.xlu0 %v589_v47  ;;  %v583_v44 = vsel %vm374_vm0, %v1073_v43, 0.0  ;;  %v1075_v52 = vpop.eup %1074 }
 0x1cc   : > { %584 = vadd.xlane.f32.xlu1 %v583_v44  ;;  %v567_v39 = vmul.f32 %v1075_v52, %v559_v27 }
 0x1ce   : > { %v1403_v57 = vpop.permute.xlu1 %634 }
 0x1cf   : > { %v1401_v55 = vpop.permute.xlu0 %639 }
 0x1d3   : > { %982 = vmatmul.msk.f32.gmra.mxu2 %vm374_vm0, %v1065_v22  ;;  %581 = vadd.xlane.f32.xlu0 %v580_v46 }
 0x1d6   : > { %v1409_v18 = vpop.permute.xlu1 %649 }
 0x1d7   : > { %v663_v41 = vmul.f32 0.0, %v1409_v18 }
 0x1db   : > { %983 = vmatmul.msk.f32.gmra.mxu2 %vm374_vm0, %v1071_v42 }
 0x1e7   : > { %654 = vperm.xlu0 %1040, %v1075_v52  }
 0x216   : > { %v570_v60 = vpop.xlane.xlu0 %569 }
 0x217   : > { %v592_v61 = vadd.f32 %v570_v60, %v560_v59  ;;  %v657_v59 = vmul.f32 0.0, %v1399_v54 }
 0x219   : > { %601 = vst.msk [vmem:[#allocation3] sm:$0xff] %vm284_vm1, %v592_v61 }
 0x220   : > { %v757_v29 = vld [vmem:[#allocation3] sm:$0xff] }
 0x221   : > { %1076 = vrcp.f32 %v757_v29  ;;  %v1043_v29 = vld [vmem:[%s1470_s3] ss:$0 sm:$0xff] }
 0x225   : > { %v706_v52 = vpop.f32.mrf.mxu2 }
 0x226   : > { %v576_v1 = vpop.xlane.xlu1 %575  ;;  %v730_v61 = vadd.f32 %v706_v52, %v657_v59 }
 0x227   : > { %v1077_v3 = vpop.eup %1076  ;;  %v594_v4 = vadd.f32 %v576_v1, %v562_v0  ;;  %v588_v37 = vpop.xlane.xlu2 %587 }
 0x228   : > { %v598_v5 = vadd.f32 %v588_v37, %v566_v2  ;;  %783 = vperm.xlu2 %1041, %v1077_v3  }
 0x229   : > { %603 = vst.msk [vmem:[#allocation3 + $0x10] sm:$0xff] %vm284_vm1, %v594_v4  ;;  %v660_v4 = vmul.f32 0.0, %v1403_v57 }
 0x22a   : > { %607 = vst.msk [vmem:[#allocation3 + $0x30] sm:$0xff] %vm284_vm1, %v598_v5 }
 0x22d   : > { %v709_v56 = vpop.f32.mrf.mxu2 }
 0x22f   : > { %v573_v7 = vpop.xlane.xlu2 %572 }
 0x230   : > { %v593_v17 = vadd.f32 %v573_v7, %v561_v16  ;;  %v759_v20 = vld [vmem:[#allocation3 + $0x10] sm:$0xff] }
 0x231   : > { %1078 = vrcp.f32 %v759_v20  ;;  %v763_v35 = vld [vmem:[#allocation3 + $0x30] sm:$0xff] }
 0x232   : > { %602 = vst.msk [vmem:[#allocation3 + $0x8] sm:$0xff] %vm284_vm1, %v593_v17  ;;  %v659_v17 = vmul.f32 0.0, %v1397_v53  ;;  %v658_v53 = vmul.f32 0.0, %v1405_v58  ;;  %v661_v58 = vmul.f32 0.0, %v1401_v55 }
 0x234   : > { %v731_v18 = vadd.f32 %v709_v56, %v658_v53 }
 0x235   : > { %v712_v60 = vpop.f32.mrf.mxu2 }
 0x237   : > { %v1079_v19 = vpop.eup %1078  ;;  %v579_v21 = vpop.xlane.xlu2 %578 }
 0x238   : > { %v595_v22 = vadd.f32 %v579_v21, %v563_v51  ;;  %793 = vperm.xlu0 %1040, %v1079_v19   ;;  %v732_v51 = vadd.f32 %v712_v60, %v659_v17 }
 0x239   : > { %v758_v23 = vld [vmem:[#allocation3 + $0x8] sm:$0xff] }
 0x23a   : > { %604 = vst.msk [vmem:[#allocation3 + $0x18] sm:$0xff] %vm284_vm1, %v595_v22  ;;  %1080 = vrcp.f32 %v758_v23 }
 0x23d   : > { %v715_v2 = vpop.f32.mrf.mxu2 }
 0x23e   : > { %v591_v26 = vpop.xlane.xlu0 %590  ;;  %v733_v37 = vadd.f32 %v715_v2, %v660_v4 }
 0x23f   : > { %v585_v33 = vpop.xlane.xlu1 %584  ;;  %v599_v28 = vadd.f32 %v591_v26, %v567_v39 }
 0x240   : > { %v1081_v30 = vpop.eup %1080  ;;  %v597_v31 = vadd.f32 %v585_v33, %v565_v24 }
 0x241   : > { %608 = vst.msk [vmem:[#allocation3 + $0x38] sm:$0xff] %vm284_vm1, %v599_v28  ;;  %788 = vperm.xlu1 %1042, %v1081_v30   ;;  %v760_v49 = vld [vmem:[#allocation3 + $0x18] sm:$0xff]  ;;  %v662_v30 = vmul.f32 0.0, %v1411_v25 }
 0x242   : > { %606 = vst.msk [vmem:[#allocation3 + $0x28] sm:$0xff] %vm284_vm1, %v597_v31  ;;  %1082 = vrcp.f32 %v760_v49 }
 0x243   : > { %1084 = vrcp.f32 %v763_v35 }
 0x245   : > { %v718_v54 = vpop.f32.mrf.mxu2 }
 0x246   : > { %v582_v40 = vpop.xlane.xlu0 %581 }
 0x247   : > { %v596_v38 = vadd.f32 %v582_v40, %v564_v34  ;;  %v734_v34 = vadd.f32 %v718_v54, %v661_v58 }
 0x248   : > { %v1083_v42 = vpop.eup %1082  ;;  %v764_v46 = vld [vmem:[#allocation3 + $0x38] sm:$0xff] }
 0x249   : > { %605 = vst.msk [vmem:[#allocation3 + $0x20] sm:$0xff] %vm284_vm1, %v596_v38  ;;  %798 = vperm.xlu2 %1041, %v1083_v42   ;;  %v762_v45 = vld [vmem:[#allocation3 + $0x28] sm:$0xff]  ;;  %v1085_v43 = vpop.eup %1084 }
 0x24a   : > { %1086 = vrcp.f32 %v762_v45 }
 0x24e   : > { %v721_v3 = vpop.f32.mrf.mxu2 }
 0x24f   : > { %v735_v31 = vadd.f32 %v721_v3, %v662_v30 }
 0x250   : > { %v1087_v47 = vpop.eup %1086  ;;  %v761_v44 = vld [vmem:[#allocation3 + $0x20] sm:$0xff] }
 0x251   : > { %808 = vperm.xlu0 %1040, %v1087_v47   ;;  %813 = vperm.xlu2 %1041, %v1085_v43   ;;  %1088 = vrcp.f32 %v761_v44 }
 0x252   : > { %1090 = vrcp.f32 %v764_v46 }
 0x256   : > { %v724_v20 = vpop.f32.mrf.mxu2 }
 0x257   : > { %v1089_v50 = vpop.eup %1088  ;;  %v736_v19 = vadd.f32 %v724_v20, %v663_v41 }
 0x258   : > { %803 = vperm.xlu1 %1042, %v1089_v50   ;;  %v1091_v48 = vpop.eup %1090 }
 0x259   : > { %v655_v5 = vpop.permute.xlu0 %654 }
 0x25e   : > { %v727_v42 = vpop.f32.mrf.mxu2 }
 0x260   : > { %818 = vperm.xlu1 %1042, %v1091_v48  }
 0x282   : > { %v784_v62 = vpop.permute.xlu2 %783 }
 0x283   : > { %v821_v63 = vmul.f32 %v784_v62, %v730_v61 }
 0x285   : > { %v833_v0 = vadd.f32 %v1043_v29, %v821_v63 }
 0x287   : > { %v841_v1 = vadd.f32 %v833_v0, %v1203_v8 }
 0x289   : > { %849 = vst [vmem:[%s1434_s14] sm:$0xff] %v841_v1 }
 0x2a3   : > { %v799_v6 = vpop.permute.xlu2 %798 }
 0x2a4   : > { %v824_v16 = vmul.f32 %v799_v6, %v733_v37 }
 0x2a6   : > { %v836_v7 = vadd.f32 %v1043_v29, %v824_v16 }
 0x2a8   : > { %v844_v8 = vadd.f32 %v836_v7, %v1219_v13 }
 0x2aa   : > { %852 = vst [vmem:[%s1434_s14 + $0x18] sm:$0xff] %v844_v8  ;;  %v794_v21 = vpop.permute.xlu0 %793 }
 0x2ab   : > { %v823_v57 = vmul.f32 %v794_v21, %v732_v51  ;;  %v814_v22 = vpop.permute.xlu2 %813 }
 0x2ac   : > { %v827_v23 = vmul.f32 %v814_v22, %v736_v19 }
 0x2ad   : > { %v835_v27 = vadd.f32 %v1043_v29, %v823_v57 }
 0x2ae   : > { %v839_v36 = vadd.f32 %v1043_v29, %v827_v23 }
 0x2af   : > { %v843_v39 = vadd.f32 %v835_v27, %v1216_v12 }
 0x2b0   : > { %v847_v24 = vadd.f32 %v839_v36, %v1206_v9 }
 0x2b1   : > { %851 = vst [vmem:[%s1434_s14 + $0x10] sm:$0xff] %v843_v39 }
 0x2b2   : > { %855 = vst [vmem:[%s1434_s14 + $0x30] sm:$0xff] %v847_v24 }
 0x2b3   : > { %v789_v13 = vpop.permute.xlu1 %788 }
 0x2b4   : > { %v822_v26 = vmul.f32 %v789_v13, %v731_v18 }
 0x2b6   : > { %v834_v33 = vadd.f32 %v1043_v29, %v822_v26 }
 0x2b8   : > { %v842_v28 = vadd.f32 %v834_v33, %v1210_v10  ;;  %v664_v10 = vmul.f32 0.0, %v655_v5 }
 0x2ba   : > { %850 = vst [vmem:[%s1434_s14 + $0x8] sm:$0xff] %v842_v28  ;;  %v737_v25 = vadd.f32 %v727_v42, %v664_v10 }
 0x2c3   : > { %v809_v49 = vpop.permute.xlu0 %808 }
 0x2c4   : > { %v826_v12 = vmul.f32 %v809_v49, %v735_v31 }
 0x2c6   : > { %v838_v32 = vadd.f32 %v1043_v29, %v826_v12 }
 0x2c8   : > { %v846_v9 = vadd.f32 %v838_v32, %v1225_v15 }
 0x2ca   : > { %854 = vst [vmem:[%s1434_s14 + $0x28] sm:$0xff] %v846_v9  ;;  %v804_v40 = vpop.permute.xlu1 %803 }
 0x2cb   : > { %v825_v35 = vmul.f32 %v804_v40, %v734_v34 }
 0x2cd   : > { %v837_v38 = vadd.f32 %v1043_v29, %v825_v35 }
 0x2cf   : > { %v845_v45 = vadd.f32 %v837_v38, %v1222_v14 }
 0x2d1   : > { %853 = vst [vmem:[%s1434_s14 + $0x20] sm:$0xff] %v845_v45 }
 0x2d2   : > { %v819_v43 = vpop.permute.xlu1 %818 }
 0x2d3   : > { %v828_v47 = vmul.f32 %v819_v43, %v737_v25 }
 0x2d5   : > { %v840_v44 = vadd.f32 %v1043_v29, %v828_v47 }
 0x2d7   : > { %v848_v46 = vadd.f32 %v840_v44, %v1212_v11 }
 0x2d9   : > { %856 = vst [vmem:[%s1434_s14 + $0x38] sm:$0xff] %v848_v46 }
 0x2da PF: > { %s14_s17 = sadd.s32 1, %s1114_s17   ;;  %s1472_s15 = smov %s1110_s16 }
 0x2db   : > { %p11_p5 = scmp.ge.s32.totalorder %s14_s17, 4   ;;  %s1473_s16 = smov %s1475_s18 }
 0x2dd   :  { %13 = sbr.rel (!%p11_p5) target bundleno = 2 (0x2), region = 77 }

</bundles_post_ra>
